<compile_context>
chip_gen: v6e
topology: v6e:2x2x1
jax: 0.10.0
libtpu: 0.0.40
codegen_flags: <defaults>
</compile_context>

<pallas_src>
import functools

import jax
import jax.numpy as jnp
import numpy as np
from jax import lax
from jax.experimental import pallas as pl
from jax.experimental.pallas import tpu as pltpu

THRESHOLD = 0.01
EPSILON = 1e-7
TAU = 1.0


def _latency_scale(n_steps: int) -> float:
    """tau * (num_steps - 1) / tmax in float32 (snntorch normalize=True, first_spike_time=0)."""
    tmax = np.float32(np.log(np.float32(THRESHOLD + EPSILON) / np.float32(EPSILON))) * np.float32(TAU)
    return float(np.float32(TAU) * np.float32(n_steps - 1) / tmax)


# --------------------------------------------------------------------------- kernel bodies

def _spike_times(x, n_steps: int, scale: float):
    """RC latency-code time step, computed at COMPACT (rows, tile_f) width. f32, exact ints."""
    d = jnp.maximum(x, jnp.float32(THRESHOLD + EPSILON))           # clamp(data, thr + eps)
    st = jnp.log(d / (d - jnp.float32(THRESHOLD)))                 # tau folded into `scale`
    st = st * jnp.float32(scale)                                   # normalize=True
    return jnp.round(jnp.minimum(st, jnp.float32(n_steps - 1)))    # round-half-even, like torch


def _step_pattern(width: int, n_steps: int):
    """Row-invariant (1, width) int32 pattern col % S (column-block offsets are multiples of S)."""
    col = lax.broadcasted_iota(jnp.int32, (1, width), 1)
    if n_steps & (n_steps - 1) == 0:                               # power of two -> bitwise and
        return jnp.bitwise_and(col, jnp.int32(n_steps - 1))
    return col % jnp.int32(n_steps)


def _latency_kernel_repeat(x_ref, o_ref, *, n_steps: int, scale: float):
    """Compact math + in-VMEM lane repeat (XLU). x_ref: (R, Ft) f32, o_ref: (R, Ft*S)."""
    t = _spike_times(x_ref[...], n_steps, scale).astype(jnp.int32)         # (R, Ft)
    t_exp = jnp.repeat(t, n_steps, axis=1)                                  # (R, Ft*S)
    s_idx = _step_pattern(o_ref.shape[-1], n_steps)                         # (1, Ft*S)
    o_ref[...] = (s_idx == t_exp).astype(o_ref.dtype)


def _latency_kernel_dot(x_ref, e_ref, o_ref, *, n_steps: int, scale: float):
    """Fallback: lane expansion via an exact one-hot matmul on the (idle) MXU.
    e_ref: (Ft, Ft*S) with e[f, c] = (c // S == f); t values are small ints so the
    bf16 matmul is exact."""
    t = _spike_times(x_ref[...], n_steps, scale)                            # (R, Ft) f32
    t = jnp.where(t == t, t, jnp.float32(0.0))                              # NaN from padded cols -> 0
    t_exp = jnp.dot(t.astype(e_ref.dtype), e_ref[...],
                    preferred_element_type=jnp.float32)                     # (R, Ft*S), exact
    s_idx = _step_pattern(o_ref.shape[-1], n_steps)
    o_ref[...] = (s_idx == t_exp.astype(jnp.int32)).astype(o_ref.dtype)


# --------------------------------------------------------------------------- tiling

def _select_tiles(n_rows, n_feat, n_steps, out_itemsize, max_tile_f, extra_vmem):
    """Generation-aware 2-D tiling (rows x feature columns) and VMEM limit."""
    try:
        vmem_bytes = int(pltpu.get_tpu_info().vmem_capacity_bytes)
    except Exception:
        vmem_bytes = 64 * 1024 * 1024          # v7x per-core VMEM: the most conservative value

    # Column (feature) tile: full F when small, else a multiple of 128 (so tile_f*S is a
    # multiple of 128 and of S -> lane-dense output blocks, exact local col % S pattern).
    if n_feat <= max(128, max_tile_f):
        tile_f = n_feat
    else:
        tile_f = max(128, (max_tile_f // 128) * 128)
    grid_c = pl.cdiv(n_feat, tile_f)

    # Row tile: cap one pipeline step (input + output tile) at ~6 MiB so even v7x's 64 MiB
    # VMEM double-buffers comfortably and large problems get >=4 pipeline steps.
    bytes_per_row = tile_f * 4 + tile_f * n_steps * out_itemsize
    step_budget = min(vmem_bytes // 8, 6 * 1024 * 1024)
    max_rows = max(8, (step_budget // bytes_per_row) // 8 * 8)
    if n_rows <= max_rows:
        tile_r, grid_r = n_rows, 1
    else:
        grid_r = pl.cdiv(n_rows, max_rows)
        tile_r = min(max_rows, ((pl.cdiv(n_rows, grid_r) + 7) // 8) * 8)   # balanced, multiple of 8
        grid_r = pl.cdiv(n_rows, tile_r)

    # v7x megacore: make sure the parallel grid has >= 2 steps whenever the batch allows it.
    if grid_r * grid_c == 1 and n_rows >= 16:
        tile_r = ((n_rows + 1) // 2 + 7) // 8 * 8
        grid_r = pl.cdiv(n_rows, tile_r)

    vmem_need = 2 * tile_r * bytes_per_row + extra_vmem + (2 << 20)
    vmem_limit = int(min(vmem_bytes - (8 << 20), max(vmem_need, 16 << 20)))
    return tile_r, grid_r, tile_f, grid_c, vmem_limit


# --------------------------------------------------------------------------- pallas_call wrappers

@functools.partial(jax.jit, static_argnums=(1, 2))
def _forward_repeat(x, n_steps: int, out_dtype_name: str):
    out_dtype = jnp.dtype(out_dtype_name)
    S = int(n_steps)
    B = x.shape[0]
    x_flat = x.reshape(B, -1).astype(jnp.float32)                  # x.view(B, -1)
    F = x_flat.shape[1]

    tile_r, grid_r, tile_f, grid_c, vmem_limit = _select_tiles(
        B, F, S, out_dtype.itemsize, max_tile_f=max(128, 8192 // S), extra_vmem=0)

    kernel = functools.partial(_latency_kernel_repeat, n_steps=S, scale=_latency_scale(S))
    return pl.pallas_call(
        kernel,
        out_shape=jax.ShapeDtypeStruct((B, F * S), out_dtype),
        grid_spec=pl.GridSpec(
            grid=(grid_r, grid_c),
            in_specs=[pl.BlockSpec((tile_r, tile_f), lambda i, j: (i, j))],
            out_specs=pl.BlockSpec((tile_r, tile_f * S), lambda i, j: (i, j)),
        ),
        compiler_params=pltpu.CompilerParams(
            dimension_semantics=("parallel", "parallel"),
            vmem_limit_bytes=vmem_limit,
        ),
    )(x_flat)


@functools.partial(jax.jit, static_argnums=(1, 2))
def _forward_dot(x, n_steps: int, out_dtype_name: str):
    out_dtype = jnp.dtype(out_dtype_name)
    S = int(n_steps)
    B = x.shape[0]
    x_flat = x.reshape(B, -1).astype(jnp.float32)
    F = x_flat.shape[1]

    e_dtype = jnp.bfloat16 if S <= 256 else jnp.float32            # bf16 exact for integer t < 256
    tf_eff = min(F, 256)
    extra = 2 * tf_eff * tf_eff * S * jnp.dtype(e_dtype).itemsize  # double-buffered expansion matrix

    tile_r, grid_r, tile_f, grid_c, vmem_limit = _select_tiles(
        B, F, S, out_dtype.itemsize, max_tile_f=256, extra_vmem=extra)

    # Block-local one-hot expansion matrix (same for every grid step -> DMA'd once).
    f_idx = jnp.arange(tile_f, dtype=jnp.int32)[:, None]
    c_idx = jnp.arange(tile_f * S, dtype=jnp.int32)[None, :]
    expand = (c_idx // S == f_idx).astype(e_dtype)                 # (tile_f, tile_f*S)

    kernel = functools.partial(_latency_kernel_dot, n_steps=S, scale=_latency_scale(S))
    return pl.pallas_call(
        kernel,
        out_shape=jax.ShapeDtypeStruct((B, F * S), out_dtype),
        grid_spec=pl.GridSpec(
            grid=(grid_r, grid_c),
            in_specs=[pl.BlockSpec((tile_r, tile_f), lambda i, j: (i, j)),
                      pl.BlockSpec((tile_f, tile_f * S), lambda i, j: (0, 0))],
            out_specs=pl.BlockSpec((tile_r, tile_f * S), lambda i, j: (i, j)),
        ),
        compiler_params=pltpu.CompilerParams(
            dimension_semantics=("parallel", "parallel"),
            vmem_limit_bytes=vmem_limit,
        ),
    )(x_flat, expand)


_EXPAND_MODE = None  # None (unprobed) | "repeat" | "dot"


def latency_coder_forward(x, n_spikes_per_timestep, out_dtype=jnp.float32):
    """Pallas implementation of LatencyCoder.forward. Returns (spikes, None, None).

    out_dtype: float32 bit-matches the reference; bf16 / int8 (0/1 exact) are opt-in and
    cut HBM write traffic 2-4x (largest wall-clock win on v5e).
    """
    global _EXPAND_MODE
    S = int(n_spikes_per_timestep)
    name = jnp.dtype(out_dtype).name
    if _EXPAND_MODE is None:
        try:
            out = jax.block_until_ready(_forward_repeat(x, S, name))
            _EXPAND_MODE = "repeat"
            return (out, None, None)
        except Exception:
            _EXPAND_MODE = "dot"                 # Mosaic rejected the in-kernel lane repeat
    if _EXPAND_MODE == "repeat":
        return (_forward_repeat(x, S, name), None, None)
    return (_forward_dot(x, S, name), None, None)


# --------------------------------------------------------------------------- reference & demo

def _reference_numpy(x, S):
    """Pure-numpy reference mirroring snntorch spikegen.latency(normalize=True)."""
    B = x.shape[0]
    xf = np.asarray(x, dtype=np.float32).reshape(B, -1)
    F = xf.shape[1]
    d = np.maximum(xf, np.float32(THRESHOLD + EPSILON))
    st = np.log(d / (d - np.float32(THRESHOLD))) * np.float32(_latency_scale(S))
    t = np.rint(np.minimum(st, np.float32(S - 1))).astype(np.int64)   # round-half-even
    out = np.zeros((B, F, S), dtype=np.float32)
    bi, fi = np.meshgrid(np.arange(B), np.arange(F), indexing="ij")
    out[bi, fi, t] = 1.0
    return out.reshape(B, -1)


if __name__ == "__main__":
    # Small shapes consistent with the module: window_size=16, n_channels=4, n_spikes=8
    window_size = 16
    n_channels = 4
    n_spikes_per_timestep = 8
    B = 2

    key = jax.random.PRNGKey(0)
    # Inputs in [0, 1] (latency coding assumes normalized intensities)
    x = jax.random.uniform(key, (B, n_channels, window_size), dtype=jnp.float32)

    spikes, _, _ = latency_coder_forward(x, n_spikes_per_timestep)
    spikes = jax.block_until_ready(spikes)

    assert spikes.shape == (B, window_size * n_channels * n_spikes_per_timestep)
    assert spikes.dtype == jnp.float32
    ref = _reference_numpy(np.asarray(x), n_spikes_per_timestep)
    assert np.array_equal(np.asarray(spikes), ref)
    # Exactly one spike per (batch, feature) across its S sub-steps.
    assert float(np.asarray(spikes).sum()) == float(B * n_channels * window_size)

    print("KERNEL_OK")
</pallas_src>

<mosaic_0001>
module attributes {stable_mosaic.version = 11 : i64} {
  func.func @_latency_kernel_repeat(%arg0: i32, %arg1: i32, %arg2: memref<2x64xf32, #tpu.memory_space<vmem>>, %arg3: memref<2x512xf32, #tpu.memory_space<vmem>>) attributes {dimension_semantics = [#tpu.dimension_semantics<parallel>, #tpu.dimension_semantics<parallel>], iteration_bounds = array<i64: 1, 1>, scalar_prefetch = 0 : i64, scratch_operands = 0 : i64, tpu.core_type = #tpu.core_type<tc>, window_params = [{transform_indices = @transform_0, window_bounds = array<i64: 2, 64>}, {transform_indices = @transform_1, window_bounds = array<i64: 2, 512>}]} {
    %c0 = arith.constant 0 : index
    %c0_0 = arith.constant 0 : index
    %0 = vector.load %arg2[%c0, %c0_0] : memref<2x64xf32, #tpu.memory_space<vmem>>, vector<2x64xf32>
    %cst = arith.constant 1.000010e-02 : f32
    %1 = vector.broadcast %cst : f32 to vector<2x64xf32>
    %2 = arith.maximumf %0, %1 : vector<2x64xf32>
    %cst_1 = arith.constant 0.00999999977 : f32
    %3 = vector.broadcast %cst_1 : f32 to vector<2x64xf32>
    %4 = arith.subf %2, %3 : vector<2x64xf32>
    %5 = arith.divf %2, %4 : vector<2x64xf32>
    %6 = math.log %5 : vector<2x64xf32>
    %cst_2 = arith.constant 0.608011722 : f32
    %7 = vector.broadcast %cst_2 : f32 to vector<2x64xf32>
    %8 = arith.mulf %6, %7 : vector<2x64xf32>
    %cst_3 = arith.constant 7.000000e+00 : f32
    %9 = vector.broadcast %cst_3 : f32 to vector<2x64xf32>
    %10 = arith.minimumf %8, %9 : vector<2x64xf32>
    %11 = math.roundeven %10 : vector<2x64xf32>
    %12 = arith.fptosi %11 : vector<2x64xf32> to vector<2x64xi32>
    %13 = vector.shape_cast %12 : vector<2x64xi32> to vector<2x64x1xi32>
    %14 = vector.broadcast %13 : vector<2x64x1xi32> to vector<2x64x8xi32>
    %15 = vector.shape_cast %14 : vector<2x64x8xi32> to vector<2x512xi32>
    %16 = tpu.iota {dimensions = array<i32: 1>} : vector<1x512xi32>
    %c7_i32 = arith.constant 7 : i32
    %17 = vector.broadcast %c7_i32 : i32 to vector<1x512xi32>
    %18 = arith.andi %16, %17 : vector<1x512xi32>
    %19 = vector.broadcast %18 : vector<1x512xi32> to vector<2x512xi32>
    %20 = arith.cmpi eq, %19, %15 : vector<2x512xi32>
    %21 = arith.extui %20 : vector<2x512xi1> to vector<2x512xi32>
    %22 = arith.sitofp %21 : vector<2x512xi32> to vector<2x512xf32>
    %c0_4 = arith.constant 0 : index
    %c0_5 = arith.constant 0 : index
    %23 = vector.load %arg3[%c0_4, %c0_5] : memref<2x512xf32, #tpu.memory_space<vmem>>, vector<2x512xf32>
    tpu.vector_store %arg3[%c0_4, %c0_5], %22 {strides = array<i32>} : memref<2x512xf32, #tpu.memory_space<vmem>>, vector<2x512xf32>,
    return
  }
  func.func @transform_0(%arg0: i32, %arg1: i32) -> (i32, i32) {
    %c0_i32 = arith.constant 0 : i32
    return %arg0, %arg1 : i32, i32
  }
  func.func @transform_1(%arg0: i32, %arg1: i32) -> (i32, i32) {
    %c0_i32 = arith.constant 0 : i32
    return %arg0, %arg1 : i32, i32
  }
}

module attributes {stable_mosaic.version = 11 : i64} {
  func.func @_latency_kernel_dot(%arg0: i32, %arg1: i32, %arg2: memref<2x64xf32, #tpu.memory_space<vmem>>, %arg3: memref<64x512xbf16, #tpu.memory_space<vmem>>, %arg4: memref<2x512xf32, #tpu.memory_space<vmem>>) attributes {dimension_semantics = [#tpu.dimension_semantics<parallel>, #tpu.dimension_semantics<parallel>], iteration_bounds = array<i64: 1, 1>, scalar_prefetch = 0 : i64, scratch_operands = 0 : i64, tpu.core_type = #tpu.core_type<tc>, window_params = [{transform_indices = @transform_0, window_bounds = array<i64: 2, 64>}, {pipeline_mode = #tpu.pipeline_mode<synchronous>, transform_indices = @transform_1, window_bounds = array<i64: 64, 512>}, {transform_indices = @transform_2, window_bounds = array<i64: 2, 512>}]} {
    %c0 = arith.constant 0 : index
    %c0_0 = arith.constant 0 : index
    %0 = vector.load %arg2[%c0, %c0_0] : memref<2x64xf32, #tpu.memory_space<vmem>>, vector<2x64xf32>
    %cst = arith.constant 1.000010e-02 : f32
    %1 = vector.broadcast %cst : f32 to vector<2x64xf32>
    %2 = arith.maximumf %0, %1 : vector<2x64xf32>
    %cst_1 = arith.constant 0.00999999977 : f32
    %3 = vector.broadcast %cst_1 : f32 to vector<2x64xf32>
    %4 = arith.subf %2, %3 : vector<2x64xf32>
    %5 = arith.divf %2, %4 : vector<2x64xf32>
    %6 = math.log %5 : vector<2x64xf32>
    %cst_2 = arith.constant 0.608011722 : f32
    %7 = vector.broadcast %cst_2 : f32 to vector<2x64xf32>
    %8 = arith.mulf %6, %7 : vector<2x64xf32>
    %cst_3 = arith.constant 7.000000e+00 : f32
    %9 = vector.broadcast %cst_3 : f32 to vector<2x64xf32>
    %10 = arith.minimumf %8, %9 : vector<2x64xf32>
    %11 = math.roundeven %10 : vector<2x64xf32>
    %12 = arith.cmpf oeq, %11, %11 : vector<2x64xf32>
    %cst_4 = arith.constant 0.000000e+00 : f32
    %13 = vector.broadcast %cst_4 : f32 to vector<2x64xf32>
    %14 = arith.select %12, %11, %13 : vector<2x64xi1>, vector<2x64xf32>
    %15 = arith.truncf %14 : vector<2x64xf32> to vector<2x64xbf16>
    %c0_5 = arith.constant 0 : index
    %c0_6 = arith.constant 0 : index
    %16 = vector.load %arg3[%c0_5, %c0_6] : memref<64x512xbf16, #tpu.memory_space<vmem>>, vector<64x512xbf16>
    %cst_7 = arith.constant dense<0.000000e+00> : vector<2x512xf32>
    %17 = tpu.matmul %15, %16, %cst_7 {dimension_numbers = #tpu.dot_dimension_numbers<[1], [0], [0], [1], [0, 0, 1, 1], [], []>} : vector<2x64xbf16>, vector<64x512xbf16>, vector<2x512xf32> -> vector<2x512xf32>
    %18 = tpu.iota {dimensions = array<i32: 1>} : vector<1x512xi32>
    %c7_i32 = arith.constant 7 : i32
    %19 = vector.broadcast %c7_i32 : i32 to vector<1x512xi32>
    %20 = arith.andi %18, %19 : vector<1x512xi32>
    %21 = arith.fptosi %17 : vector<2x512xf32> to vector<2x512xi32>
    %22 = vector.broadcast %20 : vector<1x512xi32> to vector<2x512xi32>
    %23 = arith.cmpi eq, %22, %21 : vector<2x512xi32>
    %24 = arith.extui %23 : vector<2x512xi1> to vector<2x512xi32>
    %25 = arith.sitofp %24 : vector<2x512xi32> to vector<2x512xf32>
    %c0_8 = arith.constant 0 : index
    %c0_9 = arith.constant 0 : index
    %26 = vector.load %arg4[%c0_8, %c0_9] : memref<2x512xf32, #tpu.memory_space<vmem>>, vector<2x512xf32>
    tpu.vector_store %arg4[%c0_8, %c0_9], %25 {strides = array<i32>} : memref<2x512xf32, #tpu.memory_space<vmem>>, vector<2x512xf32>,
    return
  }
  func.func @transform_0(%arg0: i32, %arg1: i32) -> (i32, i32) {
    %c0_i32 = arith.constant 0 : i32
    return %arg0, %arg1 : i32, i32
  }
  func.func @transform_1(%arg0: i32, %arg1: i32) -> (i32, i32) {
    %c0_i32 = arith.constant 0 : i32
    %c0_i32_0 = arith.constant 0 : i32
    %c0_i32_1 = arith.constant 0 : i32
    return %c0_i32, %c0_i32_0 : i32, i32
  }
  func.func @transform_2(%arg0: i32, %arg1: i32) -> (i32, i32) {
    %c0_i32 = arith.constant 0 : i32
    return %arg0, %arg1 : i32, i32
  }
}

</mosaic_0001>

<bundles_post_ra>
// kernel: _forward_repeat.1
= control target key start
LH: loop header
LB: loop body
LE: loop exit
PB: predicated region body
PF: predicated region fallthrough
CT: control target
= control target key end

     0   :  { %s1464_s0 = inlined_call_operand.vmem [shape: f32[2,64], index: 0, kind: input, shape index: {}]   ;;  %s1465_s1 = inlined_call_operand.hbm [shape: f32[2,512], index: 1, kind: output, shape index: {}]  }
   0x1   :  { %v9_v0 = vld [vmem:[%s1464_s0] sm:$0x3] }
   0x2   :  { %v10_v1 = vmax.f32 %v9_v0, 0.0100001 }
   0x3   :  { %6 = vsyncpa [#allocation3], 0  ;;  %v19_v5 = vlaneseq  ;;  %v924_v16 = vmov 1983009808   ;;  %v925_v21 = vmov 1934713408  }
   0x4   :  { %v870_v2 = vadd.f32 -0.01, %v10_v1  ;;  %v91_v17 = vunpack.c.l.s4 %v924_v16  ;;  %v122_v22 = vunpack.c.l.s4 %v925_v21  ;;  %v926_v32 = vmov 0   ;;  %s927_s0 = smov 16   ;;  %s928_s8 = smov 64  }
   0x5   :  { %v20_v8 = vshrl.u32 %v19_v5, 7  ;;  %s929_s9 = smov 80   ;;  %s930_s10 = smov 8   ;;  %vm737_vm0 = vcmask 64512   ;;  %vm739_vm1 = vcmask 130048   ;;  %vm741_vm2 = vcmask 195584  }
   0x6   :  { %898 = vrcp.f32 %v870_v2  ;;  %v92_v20 = vunpack.c.0.s8 %v91_v17  ;;  %v123_v26 = vunpack.c.0.s8 %v122_v22  ;;  %s931_s11 = smov 24   ;;  %s932_s12 = smov 32   ;;  %vm743_vm3 = vcmask 261120  }
   0x7   :  { %v21_v11 = vsub.s32 0, %v20_v8  ;;  %v56_v14 = vsub.s32 1, %v20_v8  ;;  %s933_s13 = smov 72   ;;  %s934_s14 = smov 48   ;;  %vm745_vm4 = vcmask 326656   ;;  %vm747_vm5 = vcmask 392192  }
   0x8   :  { %v958_v25 = vsub.s32 %v92_v20, %v20_v8  ;;  %v962_v31 = vsub.s32 %v123_v26, %v20_v8  ;;  %s935_s15 = smov 88   ;;  %s936_s16 = smov 96   ;;  %vm749_vm6 = vcmask 457728   ;;  %vm751_vm7 = vcmask 523264  }
   0x9   :  { %s937_s17 = smov 112   ;;  %s938_s18 = smov 40   ;;  %vm753_vm8 = vcmask 588800   ;;  %vm755_vm9 = vcmask 654336   ;;  %vm757_vm10 = vcmask 719872   ;;  %vm759_vm11 = vcmask 785408  }
   0xa   :  { %s939_s19 = smov 56   ;;  %s940_s20 = smov 104   ;;  %vm761_vm12 = vcmask 850944   ;;  %vm763_vm13 = vcmask 916480   ;;  %vm765_vm14 = vcmask 982016  }
   0xb   :  { %s941_s21 = smov 120   ;;  %s943_s22 = smov [#allocation2]  }
   0xc   :  { %s862_s23 = sshll.u32 %s943_s22, 4  ;;  %s863_s23 = int_to_ptr.vmem [resolvable:$true] %s862_s23 }
   0xd   :  { %s902_s24 = scalar_lea.vmem %s863_s23, 128  ;;  %p907_p1 = scmp.lt.s32.totalorder %s863_s23, %s863_s23 }
   0xe   :  { %p903_p0 = scmp.ne.s32.totalorder %s863_s23, %s902_s24  ;;  %p908_p2 = scmp.lt.s32.totalorder %s902_s24, %s902_s24 }
  0x10   :  { %p909_p3 = por %p908_p2, %p907_p1 }
  0x12   :  { %p910_p4 = pnand %p909_p3, %p903_p0 }
  0x13   :  { %v899_v3 = vpop.eup %898 }
  0x14   :  { %v13_v4 = vmul.f32 %v899_v3, %v10_v1 }
  0x16   :  { %900 = vlog2.f32 %v13_v4 }
  0x23   :  { %v901_v6 = vpop.eup %900 }
  0x24   :  { %v15_v7 = vmul.f32 0.6931472, %v901_v6 }
  0x26   :  { %v16_v9 = vmul.f32 0.6080117, %v15_v7 }
  0x28   :  { %v17_v10 = vmin.f32 %v16_v9, 7.0 }
  0x2a   :  { %v877_v12 = vcvt.f32.s32 %v17_v10 }
  0x2c   :  { %v22_v13 = vrot.slane %v877_v12, %v21_v11  ;;  %v57_v15 = vrot.slane %v877_v12, %v56_v14 }
  0x2e   :  { %32 = vbcast.lane.b32.xlu1 %v22_v13, 272  ;;  %24 = vbcast.lane.b32.xlu0 %v22_v13, 256 }
  0x32   :  { %40 = vbcast.lane.b32.xlu1 %v22_v13, 288  ;;  %28 = vbcast.lane.b32.xlu0 %v22_v13, 264 }
  0x36   :  { %59 = vbcast.lane.b32.xlu1 %v57_v15, 256  ;;  %48 = vbcast.lane.b32.xlu0 %v22_v13, 304 }
  0x3a   :  { %75 = vbcast.lane.b32.xlu1 %v57_v15, 288  ;;  %67 = vbcast.lane.b32.xlu0 %v57_v15, 272 }
  0x3e   :  { %36 = vbcast.lane.b32.xlu1 %v22_v13, 280  ;;  %83 = vbcast.lane.b32.xlu0 %v57_v15, 304 }
  0x42   :  { %52 = vbcast.lane.b32.xlu1 %v22_v13, 312  ;;  %44 = vbcast.lane.b32.xlu0 %v22_v13, 296 }
  0x46   :  { %71 = vbcast.lane.b32.xlu1 %v57_v15, 280  ;;  %63 = vbcast.lane.b32.xlu0 %v57_v15, 264 }
  0x4a   :  { %87 = vbcast.lane.b32.xlu1 %v57_v15, 312  ;;  %79 = vbcast.lane.b32.xlu0 %v57_v15, 296 }
  0xa0   :  { %v33_v18 = vpop.permute.xlu1 %32  ;;  %v25_v19 = vpop.permute.xlu0 %24 }
  0xa1   :  { %v96_v29 = vrot.slane %v25_v19, %v958_v25  ;;  %v89_v35 = vcombine.high %v25_v19, %v926_v32  ;;  %v974_v41 = vrot.slane %v33_v18, %v958_v25  ;;  %v221_v43 = vcombine.high %v33_v18, %v926_v32 }
  0xa3   :  { %v103_v44 = vrot.slane %v89_v35, %v958_v25  ;;  %v235_v60 = vrot.slane %v221_v43, %v958_v25 }
  0xa4   :  { %v41_v23 = vpop.permute.xlu1 %40  ;;  %v29_v24 = vpop.permute.xlu0 %28 }
  0xa5   :  { %v353_v45 = vcombine.high %v41_v23, %v926_v32  ;;  %v155_v48 = vcombine.high %v29_v24, %v926_v32  ;;  %v1002_v61 = vrot.slane %v41_v23, %v958_v25  ;;  %v1005_v62 = vrot.slane %v29_v24, %v958_v25 }
  0xa7   :  { %v1011_v2 = vrot.slane %v353_v45, %v958_v25  ;;  %v1014_v3 = vrot.slane %v155_v48, %v958_v25 }
  0xa8   :  { %v60_v27 = vpop.permute.xlu1 %59  ;;  %v49_v28 = vpop.permute.xlu0 %48 }
  0xa9   :  { %v111_v30 = vrot.slane %v60_v27, %v958_v25  ;;  %v104_v33 = vcombine.high %v60_v27, %v926_v32  ;;  %v485_v49 = vcombine.high %v49_v28, %v926_v32  ;;  %v985_v50 = vrot.slane %v49_v28, %v958_v25 }
  0xab   :  { %v120_v34 = vcombine.high %v96_v29, %v111_v30  ;;  %v118_v38 = vrot.slane %v104_v33, %v958_v25  ;;  %v119_v52 = vcombine.low %v96_v29, %v111_v30  ;;  %v1017_v4 = vrot.slane %v485_v49, %v958_v25 }
  0xac   :  { %v76_v36 = vpop.permute.xlu1 %75  ;;  %v68_v37 = vpop.permute.xlu0 %67 }
  0xad   :  { %v968_v39 = vrot.slane %v68_v37, %v958_v25  ;;  %v971_v40 = vrot.slane %v120_v34, %v962_v31  ;;  %v236_v42 = vcombine.high %v68_v37, %v926_v32  ;;  %v135_v53 = vcombine.low %v103_v44, %v118_v38 }
  0xae   :  { %v136_v54 = vcombine.high %v103_v44, %v118_v38  ;;  %v368_v55 = vcombine.high %v76_v36, %v926_v32  ;;  %v991_v56 = vrot.slane %v76_v36, %v958_v25  ;;  %v1022_v7 = vrot.slane %v119_v52, %v962_v31 }
  0xaf   :  { %619 = vrot.lane.b32.xlu1 %v971_v40, %s927_s0  ;;  %v252_v51 = vcombine.high %v974_v41, %v968_v39  ;;  %v994_v57 = vrot.slane %v236_v42, %v958_v25  ;;  %v1031_v10 = vrot.slane %v135_v53, %v962_v31 }
  0xb0   :  { %v37_v46 = vpop.permute.xlu1 %36  ;;  %v84_v47 = vpop.permute.xlu0 %83  ;;  %v1025_v8 = vrot.slane %v368_v55, %v958_v25  ;;  %v384_v11 = vcombine.high %v1002_v61, %v991_v56  ;;  %v1038_v14 = vrot.slane %v136_v54, %v962_v31 }
  0xb1   :  { %v500_v58 = vcombine.high %v84_v47, %v926_v32  ;;  %v998_v59 = vrot.slane %v84_v47, %v958_v25  ;;  %v1008_v63 = vrot.slane %v252_v51, %v962_v31  ;;  %v287_v9 = vcombine.high %v37_v46, %v926_v32 }
  0xb2   :  { %v267_v12 = vcombine.low %v235_v60, %v994_v57  ;;  %v1041_v15 = vrot.slane %v37_v46, %v958_v25  ;;  %v399_v26 = vcombine.low %v1011_v2, %v1025_v8  ;;  %v400_v27 = vcombine.high %v1011_v2, %v1025_v8 }
  0xb3   :  { %v516_v6 = vcombine.high %v985_v50, %v998_v59  ;;  %649 = vrot.lane.b32.xlu0 %v1008_v63, %s927_s0  ;;  %v514_v13 = vrot.slane %v500_v58, %v958_v25  ;;  %v268_v28 = vcombine.high %v235_v60, %v994_v57  ;;  %v301_v29 = vrot.slane %v287_v9, %v958_v25 }
  0xb4   :  { %v53_v0 = vpop.permute.xlu1 %52  ;;  %v45_v1 = vpop.permute.xlu0 %44  ;;  %v1063_v34 = vrot.slane %v384_v11, %v962_v31  ;;  %v1066_v35 = vrot.slane %v267_v12, %v962_v31 }
  0xb5   :  { %v551_v16 = vcombine.high %v53_v0, %v926_v32  ;;  %v419_v17 = vcombine.high %v45_v1, %v926_v32  ;;  %v1046_v18 = vrot.slane %v516_v6, %v962_v31  ;;  %v531_v30 = vcombine.low %v1017_v4, %v514_v13 }
  0xb6   :  { %v532_v36 = vcombine.high %v1017_v4, %v514_v13  ;;  %v558_v37 = vrot.slane %v53_v0, %v958_v25  ;;  %v1071_v38 = vrot.slane %v45_v1, %v958_v25  ;;  %v1097_v1 = vrot.slane %v268_v28, %v962_v31 }
  0xb7   :  { %709 = vrot.lane.b32.xlu0 %v1046_v18, %s927_s0  ;;  %v565_v45 = vrot.slane %v551_v16, %v958_v25  ;;  %v433_v46 = vrot.slane %v419_v17, %v958_v25  ;;  %v1092_v58 = vrot.slane %v531_v30, %v962_v31 }
  0xb8   :  { %v72_v19 = vpop.permute.xlu1 %71  ;;  %v64_v20 = vpop.permute.xlu0 %63 }
  0xb9   :  { %v302_v21 = vcombine.high %v72_v19, %v926_v32  ;;  %v309_v22 = vrot.slane %v72_v19, %v958_v25  ;;  %v170_v23 = vcombine.high %v64_v20, %v926_v32  ;;  %v177_v24 = vrot.slane %v64_v20, %v958_v25 }
  0xbb   :  { %v317_v33 = vcombine.low %v1041_v15, %v309_v22  ;;  %v185_v42 = vcombine.low %v1005_v62, %v177_v24  ;;  %v316_v47 = vrot.slane %v302_v21, %v958_v25  ;;  %v184_v48 = vrot.slane %v170_v23, %v958_v25 }
  0xbc   :  { %v88_v43 = vpop.permute.xlu1 %87  ;;  %v80_v44 = vpop.permute.xlu0 %79  ;;  %v186_v49 = vcombine.high %v1005_v62, %v177_v24  ;;  %v318_v2 = vcombine.high %v1041_v15, %v309_v22  ;;  %v1113_v21 = vrot.slane %v532_v36, %v962_v31  ;;  %v1116_v22 = vrot.slane %v399_v26, %v962_v31 }
  0xbd   :  { %v566_v51 = vcombine.high %v88_v43, %v926_v32  ;;  %v573_v52 = vrot.slane %v88_v43, %v958_v25  ;;  %v434_v53 = vcombine.high %v80_v44, %v926_v32  ;;  %v1083_v54 = vrot.slane %v80_v44, %v958_v25 }
  0xbe   :  { %v1086_v55 = vrot.slane %v317_v33, %v962_v31  ;;  %v1089_v57 = vrot.slane %v185_v42, %v962_v31  ;;  %v333_v4 = vcombine.low %v301_v29, %v316_v47  ;;  %v201_v6 = vcombine.low %v1014_v3, %v184_v48 }
  0xbf   :  { %v580_v60 = vrot.slane %v566_v51, %v958_v25  ;;  %v581_v62 = vcombine.low %v558_v37, %v573_v52  ;;  %v448_v0 = vrot.slane %v434_v53, %v958_v25  ;;  %v334_v8 = vcombine.high %v301_v29, %v316_v47 }
  0xc0   :  { %661 = vrot.lane.b32.xlu0 %v1086_v55, %s928_s8  ;;  %631 = vrot.lane.b32.xlu1 %v1089_v57, %s928_s8  ;;  %v202_v9 = vcombine.high %v1014_v3, %v184_v48  ;;  %v582_v11 = vcombine.high %v558_v37, %v573_v52  ;;  %v200_v12 = vrot.slane %v186_v49, %v962_v31 }
  0xc1   :  { %v597_v13 = vcombine.low %v565_v45, %v580_v60  ;;  %v598_v16 = vcombine.high %v565_v45, %v580_v60  ;;  %v449_v15 = vcombine.low %v1071_v38, %v1083_v54  ;;  %v1110_v17 = vrot.slane %v581_v62, %v962_v31 }
  0xc2   :  { %v465_v19 = vcombine.low %v433_v46, %v448_v0  ;;  %v466_v20 = vcombine.high %v433_v46, %v448_v0  ;;  %v1122_v3 = vrot.slane %v318_v2, %v962_v31  ;;  %v209_v23 = vrot.slane %v201_v6, %v962_v31 }
  0xc3   :  { %v1126_v24 = vrot.slane %v400_v27, %v962_v31  ;;  %v450_v28 = vcombine.high %v1071_v38, %v1083_v54  ;;  %v1131_v26 = vrot.slane %v582_v11, %v962_v31  ;;  %v216_v29 = vrot.slane %v202_v9, %v962_v31 }
  0xc4   :  { %721 = vrot.lane.b32.xlu0 %v1110_v17, %s928_s8  ;;  %635 = vrot.lane.b32.xlu1 %v200_v12, %s929_s9  ;;  %v1135_v30 = vrot.slane %v333_v4, %v962_v31  ;;  %v1138_v33 = vrot.slane %v449_v15, %v962_v31  ;;  %v1141_v36 = vrot.slane %v597_v13, %v962_v31 }
  0xc5   :  { %v1144_v27 = vrot.slane %v334_v8, %v962_v31  ;;  %v1147_v37 = vrot.slane %v598_v16, %v962_v31  ;;  %v1150_v38 = vrot.slane %v465_v19, %v962_v31  ;;  %v1154_v42 = vcombine.high %v1031_v10, %v926_v32 }
  0xc6   :  { %v1157_v43 = vrot.slane %v466_v20, %v962_v31  ;;  %v1161_v44 = vcombine.high %v1038_v14, %v926_v32  ;;  %v1169_v45 = vcombine.high %v1066_v35, %v926_v32  ;;  %v1172_v46 = vcombine.high %v209_v23, %v926_v32 }
  0xc7   :  { %v1176_v47 = vcombine.high %v1092_v58, %v926_v32  ;;  %v1179_v48 = vcombine.high %v216_v29, %v926_v32  ;;  %v1183_v49 = vcombine.high %v1097_v1, %v926_v32  ;;  %v1187_v51 = vcombine.high %v1116_v22, %v926_v32 }
  0xc8   :  { %665 = vrot.lane.b32.xlu0 %v1122_v3, %s929_s9  ;;  %679 = vrot.lane.b32.xlu1 %v1063_v34, %s927_s0  ;;  %v1191_v52 = vcombine.high %v1113_v21, %v926_v32  ;;  %v1195_v53 = vcombine.high %v1126_v24, %v926_v32  ;;  %v1199_v54 = vcombine.high %v1135_v30, %v926_v32 }
  0xc9   :  { %v1203_v60 = vcombine.high %v1141_v36, %v926_v32  ;;  %v1207_v62 = vcombine.high %v1150_v38, %v926_v32  ;;  %v1211_v0 = vcombine.high %v1144_v27, %v926_v32  ;;  %v1215_v2 = vcombine.high %v1157_v43, %v926_v32 }
  0xca   :  { %v1219_v4 = vcombine.high %v1147_v37, %v926_v32  ;;  %v151_v6 = vcombine.high %v1022_v7, %v926_v32  ;;  %v464_v8 = vrot.slane %v450_v28, %v962_v31  ;;  %v152_v9 = vcombine.high %v971_v40, %v926_v32 }
  0xcb   :  { %v217_v11 = vcombine.high %v1089_v57, %v926_v32  ;;  %v251_v40 = vcombine.low %v974_v41, %v968_v39  ;;  %v515_v13 = vcombine.low %v985_v50, %v998_v59  ;;  %v218_v16 = vcombine.high %v200_v12, %v926_v32 }
  0xcc   :  { %725 = vrot.lane.b32.xlu0 %v1131_v26, %s929_s9  ;;  %691 = vrot.lane.b32.xlu1 %v1138_v33, %s928_s8  ;;  %v383_v39 = vcombine.low %v1002_v61, %v991_v56  ;;  %v481_v61 = vcombine.high %v1138_v33, %v926_v32 }
  0xcd   :  { %v1251_v57 = vrot.slane %v515_v13, %v962_v31 }
  0xce   :  { %v1265_v59 = vrot.slane %v383_v39, %v962_v31 }
  0xcf   :  { %v547_v41 = vcombine.high %v1251_v57, %v926_v32 }
  0xd0   :  { %617 = vrot.lane.b32.xlu0 %v151_v6, %s930_s10  ;;  %695 = vrot.lane.b32.xlu1 %v464_v8, %s929_s9  ;;  %v415_v56 = vcombine.high %v1265_v59, %v926_v32 }
  0xd4   :  { %621 = vrot.lane.b32.xlu0 %v152_v9, %s931_s11  ;;  %623 = vrot.lane.b32.xlu1 %v1031_v10, %s932_s12  ;;  %v1248_v10 = vrot.slane %v251_v40, %v962_v31  ;;  %v416_v31 = vcombine.high %v1063_v34, %v926_v32  ;;  %v613_v34 = vcombine.high %v1110_v17, %v926_v32 }
  0xd6   :  { %v283_v50 = vcombine.high %v1248_v10, %v926_v32 }
  0xd8   :  { %633 = vrot.lane.b32.xlu0 %v217_v11, %s933_s13  ;;  %627 = vrot.lane.b32.xlu1 %v1038_v14, %s934_s14  ;;  %v548_v14 = vcombine.high %v1046_v18, %v926_v32  ;;  %v482_v18 = vcombine.high %v464_v8, %v926_v32 }
  0xdc   :  { %637 = vrot.lane.b32.xlu0 %v218_v16, %s935_s15  ;;  %639 = vrot.lane.b32.xlu1 %v209_v23, %s936_s16 }
  0xe0   :  { %653 = vrot.lane.b32.xlu0 %v1066_v35, %s932_s12  ;;  %643 = vrot.lane.b32.xlu1 %v216_v29, %s937_s17  ;;  %v284_v35 = vcombine.high %v1008_v63, %v926_v32  ;;  %v349_v63 = vcombine.high %v1086_v55, %v926_v32  ;;  %v614_v55 = vcombine.high %v1131_v26, %v926_v32 }
  0xe4   :  { %707 = vrot.lane.b32.xlu0 %v547_v41, %s930_s10  ;;  %647 = vrot.lane.b32.xlu1 %v283_v50, %s930_s10 }
  0xe8   :  { %711 = vrot.lane.b32.xlu0 %v548_v14, %s931_s11  ;;  %651 = vrot.lane.b32.xlu1 %v284_v35, %s931_s11 }
  0xec   :  { %713 = vrot.lane.b32.xlu0 %v1092_v58, %s932_s12  ;;  %677 = vrot.lane.b32.xlu1 %v415_v56, %s930_s10  ;;  %v350_v58 = vcombine.high %v1122_v3, %v926_v32 }
  0xf0   :  { %657 = vrot.lane.b32.xlu0 %v1097_v1, %s934_s14  ;;  %681 = vrot.lane.b32.xlu1 %v416_v31, %s931_s11 }
  0xf4   :  { %717 = vrot.lane.b32.xlu0 %v1113_v21, %s934_s14  ;;  %683 = vrot.lane.b32.xlu1 %v1116_v22, %s932_s12 }
  0xf8   :  { %687 = vrot.lane.b32.xlu1 %v1126_v24, %s934_s14  ;;  %693 = vrot.lane.b32.xlu0 %v481_v61, %s933_s13 }
  0xfc   :  { %663 = vrot.lane.b32.xlu1 %v349_v63, %s933_s13  ;;  %697 = vrot.lane.b32.xlu0 %v482_v18, %s935_s15 }
 0x100   :  { %723 = vrot.lane.b32.xlu1 %v613_v34, %s933_s13  ;;  %669 = vrot.lane.b32.xlu0 %v1135_v30, %s936_s16 }
 0x104   :  { %667 = vrot.lane.b32.xlu1 %v350_v58, %s935_s15  ;;  %729 = vrot.lane.b32.xlu0 %v1141_v36, %s936_s16 }
 0x108   :  { %727 = vrot.lane.b32.xlu1 %v614_v55, %s935_s15  ;;  %673 = vrot.lane.b32.xlu0 %v1144_v27, %s937_s17 }
 0x10c   :  { %733 = vrot.lane.b32.xlu0 %v1147_v37, %s937_s17  ;;  %699 = vrot.lane.b32.xlu1 %v1150_v38, %s936_s16 }
 0x110   :  { %625 = vrot.lane.b32.xlu0 %v1154_v42, %s938_s18  ;;  %703 = vrot.lane.b32.xlu1 %v1157_v43, %s937_s17 }
 0x114   :  { %629 = vrot.lane.b32.xlu0 %v1161_v44, %s939_s19  ;;  %655 = vrot.lane.b32.xlu1 %v1169_v45, %s938_s18 }
 0x118   :  { %641 = vrot.lane.b32.xlu0 %v1172_v46, %s940_s20  ;;  %715 = vrot.lane.b32.xlu1 %v1176_v47, %s938_s18 }
 0x11c   :  { %645 = vrot.lane.b32.xlu0 %v1179_v48, %s941_s21  ;;  %659 = vrot.lane.b32.xlu1 %v1183_v49, %s939_s19 }
 0x120   :  { %685 = vrot.lane.b32.xlu0 %v1187_v51, %s938_s18  ;;  %719 = vrot.lane.b32.xlu1 %v1191_v52, %s939_s19 }
 0x121   :  { %v620_v1 = vpop.permute.xlu1 %619 }
 0x124   :  { %689 = vrot.lane.b32.xlu0 %v1195_v53, %s939_s19  ;;  %671 = vrot.lane.b32.xlu1 %v1199_v54, %s940_s20 }
 0x125   :  { %v650_v32 = vpop.permute.xlu0 %649 }
 0x128   :  { %731 = vrot.lane.b32.xlu1 %v1203_v60, %s940_s20  ;;  %701 = vrot.lane.b32.xlu0 %v1207_v62, %s940_s20 }
 0x129   :  { %v1333_v12 = vpop.permute.xlu0 %709 }
 0x12c   :  { %675 = vrot.lane.b32.xlu1 %v1211_v0, %s941_s21  ;;  %705 = vrot.lane.b32.xlu0 %v1215_v2, %s941_s21 }
 0x130   :  { %735 = vrot.lane.b32.xlu1 %v1219_v4, %s941_s21 }
 0x132   :  { %v1336_v15 = vpop.permute.xlu1 %631  ;;  %v1338_v17 = vpop.permute.xlu0 %661 }
 0x136   :  { %v1340_v19 = vpop.permute.xlu1 %635  ;;  %v1342_v20 = vpop.permute.xlu0 %721 }
 0x13a   :  { %v1344_v21 = vpop.permute.xlu1 %679  ;;  %v1346_v22 = vpop.permute.xlu0 %665 }
 0x13e   :  { %v1348_v3 = vpop.permute.xlu1 %691  ;;  %v1350_v23 = vpop.permute.xlu0 %725 }
 0x142   :  { %v1352_v24 = vpop.permute.xlu1 %695  ;;  %v618_v28 = vpop.permute.xlu0 %617 }
 0x143   :  { %v738_v26 = vsel %vm737_vm0, %v1022_v7, %v618_v28 }
 0x144   :  { %v740_v29 = vsel %vm739_vm1, %v738_v26, %v620_v1 }
 0x146   :  { %v624_v30 = vpop.permute.xlu1 %623  ;;  %v622_v33 = vpop.permute.xlu0 %621 }
 0x147   :  { %v742_v36 = vsel %vm741_vm2, %v740_v29, %v622_v33 }
 0x148   :  { %v744_v27 = vsel %vm743_vm3, %v742_v36, %v624_v30 }
 0x14a   :  { %v628_v37 = vpop.permute.xlu1 %627  ;;  %v634_v38 = vpop.permute.xlu0 %633 }
 0x14e   :  { %v640_v42 = vpop.permute.xlu1 %639  ;;  %v638_v43 = vpop.permute.xlu0 %637 }
 0x152   :  { %v644_v44 = vpop.permute.xlu1 %643  ;;  %v654_v45 = vpop.permute.xlu0 %653 }
 0x156   :  { %v648_v46 = vpop.permute.xlu1 %647  ;;  %v708_v47 = vpop.permute.xlu0 %707 }
 0x157   :  { %v767_v7 = vsel %vm737_vm0, %v1248_v10, %v648_v46  ;;  %v797_v55 = vsel %vm737_vm0, %v1251_v57, %v708_v47 }
 0x158   :  { %v768_v49 = vsel %vm739_vm1, %v767_v7, %v650_v32 }
 0x15a   :  { %v652_v48 = vpop.permute.xlu1 %651  ;;  %v712_v51 = vpop.permute.xlu0 %711 }
 0x15b   :  { %v769_v52 = vsel %vm741_vm2, %v768_v49, %v652_v48 }
 0x15c   :  { %v770_v53 = vsel %vm743_vm3, %v769_v52, %v654_v45 }
 0x15e   :  { %v678_v54 = vpop.permute.xlu1 %677  ;;  %v714_v60 = vpop.permute.xlu0 %713 }
 0x15f   :  { %v782_v36 = vsel %vm737_vm0, %v1265_v59, %v678_v54 }
 0x162   :  { %v682_v62 = vpop.permute.xlu1 %681  ;;  %v658_v0 = vpop.permute.xlu0 %657 }
 0x166   :  { %v684_v2 = vpop.permute.xlu1 %683  ;;  %v718_v4 = vpop.permute.xlu0 %717 }
 0x16a   :  { %v1364_v6 = vpop.permute.xlu1 %687  ;;  %v1366_v8 = vpop.permute.xlu0 %693 }
 0x16e   :  { %v664_v9 = vpop.permute.xlu1 %663  ;;  %v1368_v11 = vpop.permute.xlu0 %697 }
 0x172   :  { %v724_v40 = vpop.permute.xlu1 %723  ;;  %v1370_v13 = vpop.permute.xlu0 %669 }
 0x176   :  { %v668_v16 = vpop.permute.xlu1 %667  ;;  %v1372_v10 = vpop.permute.xlu0 %729 }
 0x17a   :  { %v1374_v39 = vpop.permute.xlu1 %727  ;;  %v1376_v41 = vpop.permute.xlu0 %673 }
 0x17e   :  { %v1378_v50 = vpop.permute.xlu1 %699  ;;  %v1380_v14 = vpop.permute.xlu0 %733 }
 0x182   :  { %v1382_v35 = vpop.permute.xlu1 %703  ;;  %v626_v56 = vpop.permute.xlu0 %625 }
 0x183   :  { %v746_v31 = vsel %vm745_vm4, %v744_v27, %v626_v56 }
 0x184   :  { %v748_v61 = vsel %vm747_vm5, %v746_v31, %v628_v37 }
 0x186   :  { %v656_v63 = vpop.permute.xlu1 %655  ;;  %v630_v18 = vpop.permute.xlu0 %629 }
 0x187   :  { %v750_v34 = vsel %vm749_vm6, %v748_v61, %v630_v18  ;;  %v771_v29 = vsel %vm745_vm4, %v770_v53, %v656_v63 }
 0x188   :  { %v752_v58 = vsel %vm751_vm7, %v750_v34, %v1336_v15  ;;  %v798_v15 = vsel %vm739_vm1, %v797_v55, %v1333_v12 }
 0x189   :  { %v754_v32 = vsel %vm753_vm8, %v752_v58, %v634_v38  ;;  %v799_v57 = vsel %vm741_vm2, %v798_v15, %v712_v51  ;;  %v772_v38 = vsel %vm747_vm5, %v771_v29, %v658_v0  ;;  %v942_v15 = vmov 0.0  }
 0x18a   :  { %v716_v1 = vpop.permute.xlu1 %715  ;;  %v756_v28 = vsel %vm755_vm9, %v754_v32, %v1340_v19  ;;  %v642_v26 = vpop.permute.xlu0 %641  ;;  %v800_v19 = vsel %vm743_vm3, %v799_v57, %v714_v60  ;;  %v813_v60 = vand.u32 127, %v19_v5 }
 0x18b   :  { %v758_v30 = vsel %vm757_vm10, %v756_v28, %v638_v43  ;;  %v801_v46 = vsel %vm745_vm4, %v800_v19, %v716_v1 }
 0x18c   :  { %v760_v33 = vsel %vm759_vm11, %v758_v30, %v640_v42  ;;  %v783_v42 = vsel %vm739_vm1, %v782_v36, %v1344_v21  ;;  %v814_v56 = vadd.s32 128, %v813_v60  ;;  %v817_v31 = vand.u32 7, %v813_v60 }
 0x18d   :  { %v762_v27 = vsel %vm761_vm12, %v760_v33, %v642_v26  ;;  %v784_v47 = vsel %vm741_vm2, %v783_v42, %v682_v62 }
 0x18e   :  { %v660_v37 = vpop.permute.xlu1 %659  ;;  %v764_v43 = vsel %vm763_vm13, %v762_v27, %v644_v44  ;;  %v646_v45 = vpop.permute.xlu0 %645  ;;  %v785_v48 = vsel %vm743_vm3, %v784_v47, %v684_v2  ;;  %v802_v44 = vsel %vm747_vm5, %v801_v46, %v718_v4  ;;  %v818_v58 = vand.u32 7, %v814_v56 }
 0x18f   :  { %v773_v12 = vsel %vm749_vm6, %v772_v38, %v660_v37  ;;  %v766_v18 = vsel %vm765_vm14, %v764_v43, %v646_v45 }
 0x190   :  { %v774_v59 = vsel %vm751_vm7, %v773_v12, %v1338_v17  ;;  %vm821_vm15 = vcmp.eq.s32.totalorder %v817_v31, %v766_v18 }
 0x191   :  { %v775_v7 = vsel %vm753_vm8, %v774_v59, %v664_v9  ;;  %v871_v33 = vsel %vm821_vm15, 1.0, %v942_v15 }
 0x192   :  { %v720_v49 = vpop.permute.xlu1 %719  ;;  %v686_v51 = vpop.permute.xlu0 %685  ;;  %v776_v17 = vsel %vm755_vm9, %v775_v7, %v1346_v22 }
 0x193   :  { %v803_v52 = vsel %vm749_vm6, %v802_v44, %v720_v49  ;;  %v786_v53 = vsel %vm745_vm4, %v785_v48, %v686_v51  ;;  %v777_v4 = vsel %vm757_vm10, %v776_v17, %v668_v16 }
 0x194   :  { %v804_v21 = vsel %vm751_vm7, %v803_v52, %v1342_v20  ;;  %v787_v0 = vsel %vm747_vm5, %v786_v53, %v1364_v6  ;;  %v778_v6 = vsel %vm759_vm11, %v777_v4, %v1370_v13  ;;  %v816_v13 = vadd.s32 384, %v813_v60 }
 0x195   :  { %v805_v54 = vsel %vm753_vm8, %v804_v21, %v724_v40  ;;  %v815_v40 = vadd.s32 256, %v813_v60 }
 0x196   :  { %v672_v62 = vpop.permute.xlu1 %671  ;;  %v690_v2 = vpop.permute.xlu0 %689  ;;  %v806_v22 = vsel %vm755_vm9, %v805_v54, %v1350_v23  ;;  %v820_v30 = vand.u32 7, %v816_v13 }
 0x197   :  { %v788_v9 = vsel %vm749_vm6, %v787_v0, %v690_v2  ;;  %v807_v23 = vsel %vm757_vm10, %v806_v22, %v1374_v39  ;;  %v819_v32 = vand.u32 7, %v815_v40 }
 0x198   :  { %v789_v20 = vsel %vm751_vm7, %v788_v9, %v1348_v3  ;;  %v779_v3 = vsel %vm761_vm12, %v778_v6, %v672_v62 }
 0x199   :  { %v790_v5 = vsel %vm753_vm8, %v789_v20, %v1366_v8  ;;  %v780_v28 = vsel %vm763_vm13, %v779_v3, %v1376_v41 }
 0x19a   :  { %v732_v61 = vpop.permute.xlu1 %731  ;;  %v791_v16 = vsel %vm755_vm9, %v790_v5, %v1352_v24  ;;  %v702_v63 = vpop.permute.xlu0 %701  ;;  %v808_v24 = vsel %vm759_vm11, %v807_v23, %v1372_v10 }
 0x19b   :  { %v792_v8 = vsel %vm757_vm10, %v791_v16, %v1368_v11  ;;  %v809_v26 = vsel %vm761_vm12, %v808_v24, %v732_v61 }
 0x19c   :  { %v793_v34 = vsel %vm759_vm11, %v792_v8, %v1378_v50  ;;  %v810_v41 = vsel %vm763_vm13, %v809_v26, %v1380_v14 }
 0x19d   :  { %v794_v55 = vsel %vm761_vm12, %v793_v34, %v702_v63 }
 0x19e   :  { %v676_v1 = vpop.permute.xlu1 %675  ;;  %v795_v39 = vsel %vm763_vm13, %v794_v55, %v1382_v35  ;;  %v706_v11 = vpop.permute.xlu0 %705 }
 0x19f   :  { %v781_v50 = vsel %vm765_vm14, %v780_v28, %v676_v1  ;;  %v796_v29 = vsel %vm765_vm14, %v795_v39, %v706_v11 }
 0x1a0   :  { %vm822_vm0 = vcmp.eq.s32.totalorder %v818_v58, %v781_v50  ;;  %vm823_vm1 = vcmp.eq.s32.totalorder %v819_v32, %v796_v29 }
 0x1a1   :  { %v872_v57 = vsel %vm822_vm0, 1.0, %v942_v15  ;;  %v873_v27 = vsel %vm823_vm1, 1.0, %v942_v15 }
 0x1a2   :  { %v837_v10 = vcombine.low %v871_v33, %v872_v57  ;;  %v736_v36 = vpop.permute.xlu1 %735 }
 0x1a3   :  { %v811_v35 = vsel %vm765_vm14, %v810_v41, %v736_v36 }
 0x1a4   :  { %vm824_vm2 = vcmp.eq.s32.totalorder %v820_v30, %v811_v35  ;;  %v845_v38 = vrot.slane %v837_v10, %v958_v25 }
 0x1a5   :  { %v874_v19 = vsel %vm824_vm2, 1.0, %v942_v15 }
 0x1a6   :  { %v838_v37 = vcombine.low %v873_v27, %v874_v19 }
 0x1a8   :  { %v852_v43 = vrot.slane %v838_v37, %v958_v25 }
 0x1aa   :  { %v853_v45 = vcombine.low %v845_v38, %v852_v43 }
 0x1ac   :  { %855 = vst [vmem:[#allocation2] sm:$0xff] %v853_v45 }
 0x1ad   :  { %913 = shalt.err (!%p910_p4)
}
 0x1ae   :  { %865 = dma.vmem_to_hbm [thread:$0]  %s863_s23, 128, %s1465_s1, [#allocation3]  }
 0x1af   :  { %922 = dma.done.wait [#allocation3], 128  }
 0x1b0   :  { %923 = vsyncadd [#allocation3], 4294967168 }
 0x1b1   :  { %869 = vsyncpa [#allocation3], 1 }

// kernel: _forward_dot.1
= control target key start
LH: loop header
LB: loop body
LE: loop exit
PB: predicated region body
PF: predicated region fallthrough
CT: control target
= control target key end

     0   :  { %v363_v2 = vmov 0   ;;  %s436_s0 = inlined_call_operand.vmem [shape: f32[2,64], index: 0, kind: input, shape index: {}]   ;;  %s437_s1 = inlined_call_operand.vmem [shape: bf16[64,512], index: 1, kind: input, shape index: {}]   ;;  %s438_s2 = inlined_call_operand.hbm [shape: f32[2,512], index: 2, kind: output, shape index: {}]  }
   0x1   :  { %v313_v0 = vld [vmem:[%s437_s1 + $0x64] ss:$16 sps:$4 sm:$0xff]   ;;  %v315_v1 = vld [vmem:[%s437_s1 + $0x6c] ss:$16 sps:$4 sm:$0xff]   ;;  %158 = vmatprep.mubr.bf16.mxu0 %v363_v2  ;;  %199 = vmatprep.mubr.bf16.mxu1 %v363_v2  ;;  %v317_v3 = vld [vmem:[%s437_s1 + $0x60] ss:$16 sps:$4 sm:$0xff]  }
   0x2   :  { %134 = vmatprep.subr.bf16.mxu0 %v313_v0  ;;  %v318_v4 = vld [vmem:[%s437_s1 + $0x68] ss:$16 sps:$4 sm:$0xff]   ;;  %175 = vmatprep.subr.bf16.mxu1 %v315_v1  ;;  %v319_v5 = vld [vmem:[%s437_s1 + $0x44] ss:$16 sps:$4 sm:$0xff]   ;;  %v321_v6 = vld [vmem:[%s437_s1 + $0x4c] ss:$16 sps:$4 sm:$0xff]  }
   0x3   :  { %135 = vmatpush1.bf16.msra.mxu0 %v317_v3  ;;  %176 = vmatpush1.bf16.msra.mxu1 %v318_v4  ;;  %v323_v7 = vld [vmem:[%s437_s1 + $0x40] ss:$16 sps:$4 sm:$0xff]   ;;  %v324_v8 = vld [vmem:[%s437_s1 + $0x48] ss:$16 sps:$4 sm:$0xff]   ;;  %v325_v9 = vld [vmem:[%s437_s1 + $0x24] ss:$16 sps:$4 sm:$0xff]  }
   0x4   :  { %136 = vmatprep.subr.bf16.mxu0 %v319_v5  ;;  %177 = vmatprep.subr.bf16.mxu1 %v321_v6  ;;  %v327_v10 = vld [vmem:[%s437_s1 + $0x2c] ss:$16 sps:$4 sm:$0xff]   ;;  %v329_v11 = vld [vmem:[%s437_s1 + $0x20] ss:$16 sps:$4 sm:$0xff]   ;;  %v330_v12 = vld [vmem:[%s437_s1 + $0x28] ss:$16 sps:$4 sm:$0xff]  }
   0x5   :  { %v331_v13 = vld [vmem:[%s437_s1 + $0x4] ss:$16 sps:$4 sm:$0xff]   ;;  %v333_v14 = vld [vmem:[%s437_s1 + $0xc] ss:$16 sps:$4 sm:$0xff]   ;;  %v13_v15 = vld [vmem:[%s436_s0] sm:$0x3] }
   0x6   :  { %v14_v16 = vmax.f32 %v13_v15, 0.0100001 }
   0x7   :  { %137 = vmatpush1.bf16.msra.mxu0 %v323_v7  ;;  %178 = vmatpush1.bf16.msra.mxu1 %v324_v8 }
   0x8   :  { %138 = vmatprep.subr.bf16.mxu0 %v325_v9  ;;  %179 = vmatprep.subr.bf16.mxu1 %v327_v10 }
   0x9   :  { %7 = vsyncpa [#allocation3], 0  ;;  %v335_v17 = vld [vmem:[%s437_s1] ss:$16 sps:$4 sm:$0xff]   ;;  %v336_v18 = vld [vmem:[%s437_s1 + $0x8] ss:$16 sps:$4 sm:$0xff]   ;;  %v208_v35 = vlaneseq }
   0xa   :  { %v270_v19 = vadd.f32 -0.01, %v14_v16  ;;  %vm122_vm2 = vcmask 523264   ;;  %v364_v40 = vmov 1983009808   ;;  %v365_v1 = vmov 0.0  }
   0xb   :  { %139 = vmatpush1.bf16.msra.mxu0 %v329_v11  ;;  %180 = vmatpush1.bf16.msra.mxu1 %v330_v12  ;;  %v209_v36 = vand.u32 127, %v208_v35  ;;  %v240_v41 = vunpack.c.l.s4 %v364_v40  ;;  %v243_v53 = vshrl.u32 %v208_v35, 7  ;;  %s366_s0 = smov [#allocation2]  }
   0xc   :  { %140 = vmatprep.subr.bf16.mxu0 %v331_v13  ;;  %181 = vmatprep.subr.bf16.mxu1 %v333_v14  ;;  %337 = vrcp.f32 %v270_v19  ;;  %s262_s1 = sshll.u32 %s366_s0, 4  ;;  %s263_s1 = int_to_ptr.vmem [resolvable:$true] %s262_s1 }
   0xd   :  { %v211_v37 = vadd.s32 256, %v209_v36  ;;  %v210_v38 = vadd.s32 128, %v209_v36  ;;  %v212_v39 = vadd.s32 384, %v209_v36  ;;  %v213_v44 = vand.u32 7, %v209_v36  ;;  %s341_s15 = scalar_lea.vmem %s263_s1, 128  ;;  %p346_p1 = scmp.lt.s32.totalorder %s263_s1, %s263_s1 }
   0xe   :  { %v241_v52 = vunpack.c.0.s8 %v240_v41  ;;  %p342_p0 = scmp.ne.s32.totalorder %s263_s1, %s341_s15  ;;  %p347_p2 = scmp.lt.s32.totalorder %s341_s15, %s341_s15 }
   0xf   :  { %141 = vmatpush1.bf16.msra.mxu0 %v335_v17  ;;  %182 = vmatpush1.bf16.msra.mxu1 %v336_v18  ;;  %v215_v46 = vand.u32 7, %v211_v37  ;;  %v214_v49 = vand.u32 7, %v210_v38  ;;  %v216_v51 = vand.u32 7, %v212_v39 }
  0x10   :  { %v244_v0 = vsub.s32 %v241_v52, %v243_v53  ;;  %p348_p3 = por %p347_p2, %p346_p1 }
  0x12   :  { %p349_p4 = pnand %p348_p3, %p342_p0 }
  0x19   :  { %v338_v20 = vpop.eup %337 }
  0x1a   :  { %v17_v21 = vmul.f32 %v338_v20, %v14_v16 }
  0x1c   :  { %339 = vlog2.f32 %v17_v21 }
  0x29   :  { %v340_v22 = vpop.eup %339 }
  0x2a   :  { %v19_v23 = vmul.f32 0.6931472, %v340_v22 }
  0x2c   :  { %v20_v24 = vmul.f32 0.6080117, %v19_v23 }
  0x2e   :  { %v21_v25 = vmin.f32 %v20_v24, 7.0 }
  0x30   :  { %v295_v26 = vcvt.f32.s32 %v21_v25  ;;  %v293_v27 = vand.u32 2147483647, %v21_v25  ;;  %v298_v29 = vand.u32 2147483648, %v21_v25 }
  0x32   :  { %v296_v28 = vcvt.s32.f32 %v295_v26  ;;  %vm294_vm0 = vcmp.lt.f32.partialorder %v293_v27, 8388608.0 }
  0x34   :  { %v297_v30 = vand.u32 2147483647, %v296_v28 }
  0x36   :  { %v299_v31 = vor.u32 %v298_v29, %v297_v30 }
  0x38   :  { %v300_v32 = vsel %vm294_vm0, %v299_v31, %v21_v25 }
  0x39   :  { %vm23_vm1 = vcmp.eq.f32.partialorder %v300_v32, %v300_v32 }
  0x3a   :  { %v24_v33 = vsel %vm23_vm1, %v300_v32, 0.0 }
  0x3b   :  { %v25_v34 = vpack.c.bf16 %v24_v33, %v24_v33 }
  0x3d   :  { %287 = vmatmul.mubr.msk.bf16.vlgmr.msra.gmra.mxu0 %vm122_vm2, %v25_v34  ;;  %288 = vmatmul.mubr.msk.bf16.vlgmr.msra.gmra.mxu1 %vm122_vm2, %v25_v34 }
  0xfd   :  { %v160_v42 = vpop.f32.mrf.mxu0  ;;  %v201_v43 = vpop.f32.mrf.mxu1 }
  0xfe   :  { %v301_v45 = vtrunc.f32 %v160_v42  ;;  %v305_v47 = vtrunc.f32 %v201_v43 }
  0xff   :  { %v162_v48 = vpop.f32.mrf.mxu0  ;;  %v203_v50 = vpop.f32.mrf.mxu1 }
 0x100   :  { %v302_v54 = vcvt.f32.s32 %v301_v45  ;;  %v306_v55 = vcvt.f32.s32 %v305_v47  ;;  %v303_v56 = vtrunc.f32 %v162_v48  ;;  %v307_v57 = vtrunc.f32 %v203_v50 }
 0x101   :  { %v164_v58 = vpop.f32.mrf.mxu0  ;;  %v205_v59 = vpop.f32.mrf.mxu1 }
 0x102   :  { %vm221_vm3 = vcmp.eq.s32.totalorder %v213_v44, %v302_v54  ;;  %vm223_vm4 = vcmp.eq.s32.totalorder %v215_v46, %v306_v55  ;;  %v304_v60 = vcvt.f32.s32 %v303_v56  ;;  %v308_v61 = vcvt.f32.s32 %v307_v57 }
 0x103   :  { %v165_v62 = vpop.f32.mrf.mxu0  ;;  %v206_v63 = vpop.f32.mrf.mxu1  ;;  %v289_v2 = vsel %vm221_vm3, 1.0, %v365_v1  ;;  %v291_v3 = vsel %vm223_vm4, 1.0, %v365_v1 }
 0x104   :  { %vm222_vm5 = vcmp.eq.s32.totalorder %v214_v49, %v304_v60  ;;  %vm224_vm6 = vcmp.eq.s32.totalorder %v216_v51, %v308_v61 }
 0x105   :  { %v290_v4 = vsel %vm222_vm5, 1.0, %v365_v1  ;;  %v292_v5 = vsel %vm224_vm6, 1.0, %v365_v1 }
 0x106   :  { %v237_v6 = vcombine.low %v289_v2, %v290_v4  ;;  %v238_v7 = vcombine.low %v291_v3, %v292_v5 }
 0x108   :  { %v245_v8 = vrot.slane %v237_v6, %v244_v0  ;;  %v252_v9 = vrot.slane %v238_v7, %v244_v0 }
 0x10a   :  { %v253_v10 = vcombine.low %v245_v8, %v252_v9 }
 0x10c   :  { %255 = vst [vmem:[#allocation2] sm:$0xff] %v253_v10 }
 0x10d   :  { %352 = shalt.err (!%p349_p4)
}
 0x10e   :  { %265 = dma.vmem_to_hbm [thread:$0]  %s263_s1, 128, %s438_s2, [#allocation3]  }
 0x10f   :  { %361 = dma.done.wait [#allocation3], 128  }
 0x110   :  { %362 = vsyncadd [#allocation3], 4294967168 }
 0x111   :  { %269 = vsyncpa [#allocation3], 1 }

</bundles_post_ra>
